<compile_context>
chip_gen: v7x
topology: tpu7x:2x2x1
jax: 0.10.0
libtpu: 0.0.40
codegen_flags: <defaults>
</compile_context>

<pallas_src>
import functools

import jax
import jax.numpy as jnp
from jax.experimental import pallas as pl
from jax.experimental.pallas import tpu as pltpu


_LANE = 128       # output features padded to a multiple of this (lane-dense vst)
_TB_ROUND = 16    # batch tile rounding (bf16-friendly sublane packing)
_TB_MAX = 1024    # batch tile cap (tiny VMEM footprint; ~86% HBM roofline)


def _round_up(x, m):
    return ((x + m - 1) // m) * m


def _batch_tile(batch):
    """Batch tile size.  >=2 grid steps for large batches (v7x megacore split);
    a single exact full-extent tile when the batch is small."""
    tb = min(_TB_MAX, _round_up(max(pl.cdiv(batch, 2), 1), _TB_ROUND))
    if tb >= batch:
        return batch          # block == full array dim (always legal)
    return tb                 # multiple of 16 -> satisfies (8,128) rule


def _pad_cols(a, cols):
    r, c = a.shape
    if c == cols:
        return a
    return jnp.pad(a, ((0, 0), (0, cols - c)))


# ----------------------------------------------------------------------------
# Pallas kernels
# ----------------------------------------------------------------------------
def _linear_kernel(x_ref, w_ref, b_ref, o_ref):
    # In-kernel cast: x arrives f32 from HBM, bf16 operands on the MXU,
    # f32 accumulation, f32 bias add, lane-dense store.
    x = x_ref[...].astype(jnp.bfloat16)
    o_ref[...] = (
        jnp.dot(x, w_ref[...], preferred_element_type=jnp.float32) + b_ref[...]
    )


def _diag_gaussian_kernel(x_ref, wm_ref, ws_ref, bm_ref, bs_ref,
                          mean_ref, std_ref):
    # Two dots written straight into the output refs -- no fused f32
    # intermediate, no extra VMEM copy.  exp() -> EUP slot (free-ish).
    x = x_ref[...].astype(jnp.bfloat16)
    mean_ref[...] = (
        jnp.dot(x, wm_ref[...], preferred_element_type=jnp.float32) + bm_ref[...]
    )
    std_ref[...] = jnp.exp(
        jnp.dot(x, ws_ref[...], preferred_element_type=jnp.float32) + bs_ref[...]
    )


_COMPILER_PARAMS = pltpu.CompilerParams(
    dimension_semantics=("parallel",),          # batch axis -> megacore split
    vmem_limit_bytes=32 * 1024 * 1024,          # safe on v5e/v6e/v7x
)


# ----------------------------------------------------------------------------
# Wrappers (jitted so the column slice shares the dispatch with the kernel)
# ----------------------------------------------------------------------------
@functools.partial(jax.jit, static_argnums=(3,))
def pallas_linear(x, w_pad, b_pad, num_outputs):
    """x: (B, Din) f32; w_pad: (Din, Dout_pad) bf16; b_pad: (1, Dout_pad) f32."""
    B, Din = x.shape
    dout_pad = w_pad.shape[1]
    TB = _batch_tile(B)
    grid = (pl.cdiv(B, TB),)

    cost = pl.CostEstimate(
        flops=2 * B * Din * dout_pad,
        transcendentals=0,
        bytes_accessed=(B * Din * 4 + Din * dout_pad * 2
                        + dout_pad * 4 + B * dout_pad * 4),
    )
    out = pl.pallas_call(
        _linear_kernel,
        out_shape=jax.ShapeDtypeStruct((B, dout_pad), jnp.float32),
        grid=grid,
        in_specs=[
            pl.BlockSpec((TB, Din), lambda i: (i, 0)),
            pl.BlockSpec((Din, dout_pad), lambda i: (0, 0)),   # VMEM-resident
            pl.BlockSpec((1, dout_pad), lambda i: (0, 0)),     # VMEM-resident
        ],
        out_specs=pl.BlockSpec((TB, dout_pad), lambda i: (i, 0)),
        compiler_params=_COMPILER_PARAMS,
        cost_estimate=cost,
    )(x, w_pad, b_pad)
    return out[:, :num_outputs]


@functools.partial(jax.jit, static_argnums=(5,))
def pallas_diag_gaussian(x, wm_pad, ws_pad, bm_pad, bs_pad, num_outputs):
    """Mean / std=exp(logstd) head.  Returns (mean, std), each (B, num_outputs) f32."""
    B, Din = x.shape
    dout_pad = wm_pad.shape[1]
    TB = _batch_tile(B)
    grid = (pl.cdiv(B, TB),)

    cost = pl.CostEstimate(
        flops=2 * B * Din * (2 * dout_pad),
        transcendentals=B * dout_pad,
        bytes_accessed=(B * Din * 4 + 2 * Din * dout_pad * 2
                        + 2 * dout_pad * 4 + 2 * B * dout_pad * 4),
    )
    mean, std = pl.pallas_call(
        _diag_gaussian_kernel,
        out_shape=(jax.ShapeDtypeStruct((B, dout_pad), jnp.float32),
                   jax.ShapeDtypeStruct((B, dout_pad), jnp.float32)),
        grid=grid,
        in_specs=[
            pl.BlockSpec((TB, Din), lambda i: (i, 0)),
            pl.BlockSpec((Din, dout_pad), lambda i: (0, 0)),   # VMEM-resident
            pl.BlockSpec((Din, dout_pad), lambda i: (0, 0)),   # VMEM-resident
            pl.BlockSpec((1, dout_pad), lambda i: (0, 0)),     # VMEM-resident
            pl.BlockSpec((1, dout_pad), lambda i: (0, 0)),     # VMEM-resident
        ],
        out_specs=(pl.BlockSpec((TB, dout_pad), lambda i: (i, 0)),
                   pl.BlockSpec((TB, dout_pad), lambda i: (i, 0))),
        compiler_params=_COMPILER_PARAMS,
        cost_estimate=cost,
    )(x, wm_pad, ws_pad, bm_pad, bs_pad)
    return mean[:, :num_outputs], std[:, :num_outputs]


# ----------------------------------------------------------------------------
# Deterministic parameter init (mirrors nn.init.orthogonal_ + zero bias)
# ----------------------------------------------------------------------------
def orthogonal_init(key, num_inputs, num_outputs, gain=1.0):
    """Orthogonal weight, shape (num_inputs, num_outputs) (i.e. PyTorch W.T)."""
    a = jax.random.normal(key, (max(num_inputs, num_outputs),
                                min(num_inputs, num_outputs)), jnp.float32)
    q, r = jnp.linalg.qr(a)
    d = jnp.diag(r)
    q = q * jnp.where(d >= 0, 1.0, -1.0)         # sign fix
    if num_inputs < num_outputs:
        q = q.T
    w = gain * q[:num_inputs, :num_outputs]
    b = jnp.zeros((num_outputs,), jnp.float32)
    return w.astype(jnp.float32), b


# ----------------------------------------------------------------------------
# Lightweight distribution wrappers (pure JAX glue, no hot-path compute)
# ----------------------------------------------------------------------------
class FixedCategorical:
    def __init__(self, logits):
        self.logits = logits                                  # (B, A)

    def mode(self):
        return jnp.argmax(self.logits, axis=-1, keepdims=True)

    def log_prob(self, actions):                              # actions: (B, 1)
        logp = jax.nn.log_softmax(self.logits, axis=-1)
        a = actions.squeeze(-1)
        lp = jnp.take_along_axis(logp, a[:, None], axis=-1)
        return lp.reshape(actions.shape[0], -1).sum(-1, keepdims=True)


class FixedBernoulli:
    def __init__(self, logits):
        self.logits = logits
        self.probs = jax.nn.sigmoid(logits)

    def mode(self):
        return (self.probs > 0.5).astype(jnp.float32)

    def entropy(self):
        p = self.probs
        ent = -(p * jnp.log(jnp.clip(p, 1e-12, 1.0))
                + (1 - p) * jnp.log(jnp.clip(1 - p, 1e-12, 1.0)))
        return ent.sum(-1)

    def log_prob(self, actions):
        lp = (actions * jax.nn.log_sigmoid(self.logits)
              + (1 - actions) * jax.nn.log_sigmoid(-self.logits))
        return lp.reshape(actions.shape[0], -1).sum(-1, keepdims=True)


class FixedNormal:
    def __init__(self, mean, std):
        self.mean = mean
        self.std = std

    def mode(self):
        return self.mean

    def entropy(self):
        ent = 0.5 + 0.5 * jnp.log(2 * jnp.pi) + jnp.log(self.std)
        return ent.sum(-1)

    def log_prob(self, actions):
        var = self.std ** 2
        lp = (-((actions - self.mean) ** 2) / (2 * var)
              - jnp.log(self.std) - 0.5 * jnp.log(2 * jnp.pi))
        return lp.reshape(actions.shape[0], -1).sum(-1, keepdims=True)


# ----------------------------------------------------------------------------
# PolicyHead
# ----------------------------------------------------------------------------
class PolicyHead:
    """action_space_kind in {"box", "discrete", "multibinary"}.
    (gym isn't available here, so the space type is passed as a string.)"""

    def __init__(self, num_inputs, num_outputs, action_space_kind, key):
        self.kind = action_space_kind
        self.num_outputs = num_outputs
        self.dout_pad = _round_up(num_outputs, _LANE)

        if action_space_kind == "box":            # DiagGaussianHead, gain=1
            k1, k2 = jax.random.split(key)
            wm, bm = orthogonal_init(k1, num_inputs, num_outputs, 1.0)
            ws, bs = orthogonal_init(k2, num_inputs, num_outputs, 1.0)
            self.wm = _pad_cols(wm, self.dout_pad).astype(jnp.bfloat16)
            self.ws = _pad_cols(ws, self.dout_pad).astype(jnp.bfloat16)
            self.bm = _pad_cols(bm[None, :], self.dout_pad)      # f32 bias
            self.bs = _pad_cols(bs[None, :], self.dout_pad)      # f32 bias
        elif action_space_kind in ("discrete", "multibinary"):
            gain = 0.01 if action_space_kind == "discrete" else 1.0
            w, b = orthogonal_init(key, num_inputs, num_outputs, gain)
            self.w = _pad_cols(w, self.dout_pad).astype(jnp.bfloat16)
            self.b = _pad_cols(b[None, :], self.dout_pad)         # f32 bias
        else:
            # TODO(synk): MultiDiscrete (MultiCategoricalHead) is not defined
            # in the reference module either; only Box/Discrete/MultiBinary.
            raise ValueError("Only box, discrete, multibinary supported")

    def __call__(self, x):
        if self.kind == "box":
            mean, std = pallas_diag_gaussian(
                x, self.wm, self.ws, self.bm, self.bs, self.num_outputs)
            return FixedNormal(mean, std)
        logits = pallas_linear(x, self.w, self.b, self.num_outputs)
        if self.kind == "discrete":
            return FixedCategorical(logits)
        return FixedBernoulli(logits)


# ----------------------------------------------------------------------------
# Reference (same bf16 operands, f32 accumulation) for correctness checks
# ----------------------------------------------------------------------------
def _ref_linear(x, w_pad_bf16, b_pad_f32, num_outputs):
    y = jnp.dot(x.astype(jnp.bfloat16), w_pad_bf16,
                preferred_element_type=jnp.float32) + b_pad_f32
    return y[:, :num_outputs]


# ----------------------------------------------------------------------------
# Demo / smoke test
# ----------------------------------------------------------------------------
if __name__ == "__main__":
    key = jax.random.PRNGKey(0)
    kx, kb, kc, kbn, kxl = jax.random.split(key, 5)

    B, NUM_INPUTS, NUM_OUTPUTS = 4, 32, 6
    x = jax.random.normal(kx, (B, NUM_INPUTS), jnp.float32)

    # ---- Box action space -> DiagGaussianHead (two-dot direct-store kernel) --
    head_box = PolicyHead(NUM_INPUTS, NUM_OUTPUTS, "box", kb)
    dist_box = head_box(x)
    jax.block_until_ready(dist_box.mean)
    jax.block_until_ready(dist_box.std)

    ref_mean = _ref_linear(x, head_box.wm, head_box.bm, NUM_OUTPUTS)
    ref_std = jnp.exp(_ref_linear(x, head_box.ws, head_box.bs, NUM_OUTPUTS))
    assert jnp.allclose(dist_box.mean, ref_mean, atol=1e-3, rtol=1e-3)
    assert jnp.allclose(dist_box.std, ref_std, atol=1e-3, rtol=1e-3)

    # Loose check vs a pure-f32 reference (bf16 operand rounding only).
    ref_mean_f32 = (x @ head_box.wm.astype(jnp.float32)
                    + head_box.bm)[:, :NUM_OUTPUTS]
    assert jnp.allclose(dist_box.mean, ref_mean_f32, atol=0.1, rtol=0.1)

    # ---- Discrete action space -> CategoricalHead ----
    head_cat = PolicyHead(NUM_INPUTS, NUM_OUTPUTS, "discrete", kc)
    dist_cat = head_cat(x)
    jax.block_until_ready(dist_cat.logits)
    assert jnp.allclose(dist_cat.logits,
                        _ref_linear(x, head_cat.w, head_cat.b, NUM_OUTPUTS),
                        atol=1e-3, rtol=1e-3)
    _ = dist_cat.mode()

    # ---- MultiBinary action space -> BernoulliHead ----
    head_bin = PolicyHead(NUM_INPUTS, NUM_OUTPUTS, "multibinary", kbn)
    dist_bin = head_bin(x)
    jax.block_until_ready(dist_bin.logits)
    assert jnp.allclose(dist_bin.logits,
                        _ref_linear(x, head_bin.w, head_bin.b, NUM_OUTPUTS),
                        atol=1e-3, rtol=1e-3)
    _ = dist_bin.mode()

    # ---- Larger, non-multiple batch exercises >1 grid step + partial tile ----
    x_large = jax.random.normal(kxl, (1030, NUM_INPUTS), jnp.float32)
    dist_large = head_cat(x_large)
    jax.block_until_ready(dist_large.logits)
    assert dist_large.logits.shape == (1030, NUM_OUTPUTS)
    assert jnp.allclose(dist_large.logits,
                        _ref_linear(x_large, head_cat.w, head_cat.b, NUM_OUTPUTS),
                        atol=1e-3, rtol=1e-3)

    # Same for the gaussian head (partial last block on two outputs).
    dist_large_box = head_box(x_large)
    jax.block_until_ready(dist_large_box.mean)
    assert jnp.allclose(dist_large_box.mean,
                        _ref_linear(x_large, head_box.wm, head_box.bm, NUM_OUTPUTS),
                        atol=1e-3, rtol=1e-3)

    print("KERNEL_OK")
</pallas_src>

<mosaic_0001>
module attributes {stable_mosaic.version = 11 : i64} {
  func.func @_diag_gaussian_kernel(%arg0: i32, %arg1: memref<4x32xf32, #tpu.memory_space<vmem>>, %arg2: memref<32x128xbf16, #tpu.memory_space<vmem>>, %arg3: memref<32x128xbf16, #tpu.memory_space<vmem>>, %arg4: memref<1x128xf32, #tpu.memory_space<vmem>>, %arg5: memref<1x128xf32, #tpu.memory_space<vmem>>, %arg6: memref<4x128xf32, #tpu.memory_space<vmem>>, %arg7: memref<4x128xf32, #tpu.memory_space<vmem>>) attributes {dimension_semantics = [#tpu.dimension_semantics<parallel>], iteration_bounds = array<i64: 1>, scalar_prefetch = 0 : i64, scratch_operands = 0 : i64, tpu.core_type = #tpu.core_type<tc>, window_params = [{transform_indices = @transform_0, window_bounds = array<i64: 4, 32>}, {pipeline_mode = #tpu.pipeline_mode<synchronous>, transform_indices = @transform_1, window_bounds = array<i64: 32, 128>}, {pipeline_mode = #tpu.pipeline_mode<synchronous>, transform_indices = @transform_2, window_bounds = array<i64: 32, 128>}, {pipeline_mode = #tpu.pipeline_mode<synchronous>, transform_indices = @transform_3, window_bounds = array<i64: 1, 128>}, {pipeline_mode = #tpu.pipeline_mode<synchronous>, transform_indices = @transform_4, window_bounds = array<i64: 1, 128>}, {transform_indices = @transform_5, window_bounds = array<i64: 4, 128>}, {transform_indices = @transform_6, window_bounds = array<i64: 4, 128>}]} {
    %c0 = arith.constant 0 : index
    %c0_0 = arith.constant 0 : index
    %0 = vector.load %arg1[%c0, %c0_0] : memref<4x32xf32, #tpu.memory_space<vmem>>, vector<4x32xf32>
    %1 = arith.truncf %0 : vector<4x32xf32> to vector<4x32xbf16>
    %c0_1 = arith.constant 0 : index
    %c0_2 = arith.constant 0 : index
    %2 = vector.load %arg2[%c0_1, %c0_2] : memref<32x128xbf16, #tpu.memory_space<vmem>>, vector<32x128xbf16>
    %cst = arith.constant dense<0.000000e+00> : vector<4x128xf32>
    %3 = tpu.matmul %1, %2, %cst {dimension_numbers = #tpu.dot_dimension_numbers<[1], [0], [0], [1], [0, 0, 1, 1], [], []>} : vector<4x32xbf16>, vector<32x128xbf16>, vector<4x128xf32> -> vector<4x128xf32>
    %c0_3 = arith.constant 0 : index
    %c0_4 = arith.constant 0 : index
    %4 = vector.load %arg4[%c0_3, %c0_4] : memref<1x128xf32, #tpu.memory_space<vmem>>, vector<1x128xf32>
    %5 = vector.broadcast %4 : vector<1x128xf32> to vector<4x128xf32>
    %6 = arith.addf %3, %5 : vector<4x128xf32>
    %c0_5 = arith.constant 0 : index
    %c0_6 = arith.constant 0 : index
    %7 = vector.load %arg6[%c0_5, %c0_6] : memref<4x128xf32, #tpu.memory_space<vmem>>, vector<4x128xf32>
    tpu.vector_store %arg6[%c0_5, %c0_6], %6 {strides = array<i32>} : memref<4x128xf32, #tpu.memory_space<vmem>>, vector<4x128xf32>,
    %c0_7 = arith.constant 0 : index
    %c0_8 = arith.constant 0 : index
    %8 = vector.load %arg3[%c0_7, %c0_8] : memref<32x128xbf16, #tpu.memory_space<vmem>>, vector<32x128xbf16>
    %cst_9 = arith.constant dense<0.000000e+00> : vector<4x128xf32>
    %9 = tpu.matmul %1, %8, %cst_9 {dimension_numbers = #tpu.dot_dimension_numbers<[1], [0], [0], [1], [0, 0, 1, 1], [], []>} : vector<4x32xbf16>, vector<32x128xbf16>, vector<4x128xf32> -> vector<4x128xf32>
    %c0_10 = arith.constant 0 : index
    %c0_11 = arith.constant 0 : index
    %10 = vector.load %arg5[%c0_10, %c0_11] : memref<1x128xf32, #tpu.memory_space<vmem>>, vector<1x128xf32>
    %11 = vector.broadcast %10 : vector<1x128xf32> to vector<4x128xf32>
    %12 = arith.addf %9, %11 : vector<4x128xf32>
    %13 = math.exp %12 : vector<4x128xf32>
    %c0_12 = arith.constant 0 : index
    %c0_13 = arith.constant 0 : index
    %14 = vector.load %arg7[%c0_12, %c0_13] : memref<4x128xf32, #tpu.memory_space<vmem>>, vector<4x128xf32>
    tpu.vector_store %arg7[%c0_12, %c0_13], %13 {strides = array<i32>} : memref<4x128xf32, #tpu.memory_space<vmem>>, vector<4x128xf32>,
    return
  }
  func.func @transform_0(%arg0: i32) -> (i32, i32) {
    %c0_i32 = arith.constant 0 : i32
    %c0_i32_0 = arith.constant 0 : i32
    return %arg0, %c0_i32 : i32, i32
  }
  func.func @transform_1(%arg0: i32) -> (i32, i32) {
    %c0_i32 = arith.constant 0 : i32
    %c0_i32_0 = arith.constant 0 : i32
    %c0_i32_1 = arith.constant 0 : i32
    return %c0_i32, %c0_i32_0 : i32, i32
  }
  func.func @transform_2(%arg0: i32) -> (i32, i32) {
    %c0_i32 = arith.constant 0 : i32
    %c0_i32_0 = arith.constant 0 : i32
    %c0_i32_1 = arith.constant 0 : i32
    return %c0_i32, %c0_i32_0 : i32, i32
  }
  func.func @transform_3(%arg0: i32) -> (i32, i32) {
    %c0_i32 = arith.constant 0 : i32
    %c0_i32_0 = arith.constant 0 : i32
    %c0_i32_1 = arith.constant 0 : i32
    return %c0_i32, %c0_i32_0 : i32, i32
  }
  func.func @transform_4(%arg0: i32) -> (i32, i32) {
    %c0_i32 = arith.constant 0 : i32
    %c0_i32_0 = arith.constant 0 : i32
    %c0_i32_1 = arith.constant 0 : i32
    return %c0_i32, %c0_i32_0 : i32, i32
  }
  func.func @transform_5(%arg0: i32) -> (i32, i32) {
    %c0_i32 = arith.constant 0 : i32
    %c0_i32_0 = arith.constant 0 : i32
    return %arg0, %c0_i32 : i32, i32
  }
  func.func @transform_6(%arg0: i32) -> (i32, i32) {
    %c0_i32 = arith.constant 0 : i32
    %c0_i32_0 = arith.constant 0 : i32
    return %arg0, %c0_i32 : i32, i32
  }
}

</mosaic_0001>

<bundles_post_ra>
// kernel: pallas_diag_gaussian.1
= control target key start
LH: loop header
LB: loop body
LE: loop exit
PB: predicated region body
PF: predicated region fallthrough
CT: control target
= control target key end

     0   :  { %12 = vsyncpa [#allocation3], 0  ;;  %s509_s0 = inlined_call_operand.hbm [shape: f32[4,32], index: 0, kind: input, shape index: {}]   ;;  %s510_s1 = inlined_call_operand.hbm [shape: bf16[32,128], index: 1, kind: input, shape index: {}]   ;;  %s511_s2 = inlined_call_operand.hbm [shape: bf16[32,128], index: 2, kind: input, shape index: {}]   ;;  %s512_s3 = inlined_call_operand.vmem [shape: f32[1,128], index: 3, kind: input, shape index: {}]   ;;  %s513_s4 = inlined_call_operand.vmem [shape: f32[1,128], index: 4, kind: input, shape index: {}]   ;;  %s514_s5 = inlined_call_operand.hbm [shape: f32[4,128], index: 5, kind: output, shape index: {0}]   ;;  %s515_s6 = inlined_call_operand.hbm [shape: f32[4,128], index: 6, kind: output, shape index: {1}]  }
   0x1   :  { %13 = vsyncpa [#allocation6], 0 }
   0x2   :  { %14 = vsyncpa [#allocation4], 0 }
   0x3   :  { %15 = vsyncpa [#allocation10], 0  ;;  %s393_s21 = smov [#allocation5]   ;;  %s275_s25 = scalar_lea.hbm %s510_s1, 256 }
   0x4   :  { %s31_s22 = sshll.u32 %s393_s21, 4  ;;  %p276_p0 = scmp.ne.s32.totalorder %s510_s1, %s275_s25  ;;  %s32_s22 = int_to_ptr.vmem [resolvable:$true] %s31_s22 }
   0x5   :  { %p279_p1 = scmp.lt.u32.totalorder %s275_s25, %s510_s1 }
   0x7   :  { %p281_p2 = pnand %p279_p1, %p276_p0 }
   0x9   :  { %284 = shalt.err (!%p281_p2)
}
   0xa   :  { %s285_s30 = scalar_lea.vmem %s32_s22, 256  ;;  %p290_p4 = scmp.lt.s32.totalorder %s32_s22, %s32_s22 }
   0xb   :  { %p286_p3 = scmp.ne.s32.totalorder %s32_s22, %s285_s30  ;;  %p291_p5 = scmp.lt.s32.totalorder %s285_s30, %s285_s30 }
   0xd   :  { %p292_p6 = por %p291_p5, %p290_p4 }
   0xf   :  { %p293_p7 = pnand %p292_p6, %p286_p3 }
  0x11   :  { %296 = shalt.err (!%p293_p7)
}
  0x12   :  { %s394_s7 = smov 64   ;;  %s395_s8 = smov 4  }
  0x13   :  { %37 = dma.hbm_to_vmem [thread:$0]  %s510_s1, 256, %s32_s22, [#allocation6], %s394_s7, %s394_s7, %s395_s8  }
  0x14   :  { %s396_s11 = smov [#allocation2]   ;;  %s397_s13 = smov [#allocation7]  }
  0x15   :  { %s22_s12 = sshll.u32 %s396_s11, 4  ;;  %s43_s14 = sshll.u32 %s397_s13, 4  ;;  %s23_s12 = int_to_ptr.vmem [resolvable:$true] %s22_s12  ;;  %s44_s14 = int_to_ptr.vmem [resolvable:$true] %s43_s14 }
  0x16   :  { %s297_s17 = scalar_lea.hbm %s509_s0, 64 }
  0x17   :  { %p298_p8 = scmp.ne.s32.totalorder %s509_s0, %s297_s17  ;;  %p301_p9 = scmp.lt.u32.totalorder %s297_s17, %s509_s0 }
  0x19   :  { %p303_p10 = pnand %p301_p9, %p298_p8 }
  0x1b   :  { %306 = shalt.err (!%p303_p10)
}
  0x1c   :  { %s307_s1 = scalar_lea.vmem %s23_s12, 64  ;;  %p312_p12 = scmp.lt.s32.totalorder %s23_s12, %s23_s12 }
  0x1d   :  { %p308_p11 = scmp.ne.s32.totalorder %s23_s12, %s307_s1  ;;  %p313_p13 = scmp.lt.s32.totalorder %s307_s1, %s307_s1 }
  0x1f   :  { %p314_p0 = por %p313_p13, %p312_p12 }
  0x21   :  { %p315_p1 = pnand %p314_p0, %p308_p11 }
  0x23   :  { %318 = shalt.err (!%p315_p1)
}
  0x24   :  { %25 = dma.hbm_to_vmem [thread:$0]  %s509_s0, 64, %s23_s12, [#allocation3]  }
  0x25   :  { %s319_s26 = scalar_lea.hbm %s511_s2, 256 }
  0x26   :  { %p320_p2 = scmp.ne.s32.totalorder %s511_s2, %s319_s26  ;;  %p323_p3 = scmp.lt.u32.totalorder %s319_s26, %s511_s2 }
  0x28   :  { %p325_p4 = pnand %p323_p3, %p320_p2 }
  0x2a   :  { %328 = shalt.err (!%p325_p4)
}
  0x2b   :  { %s329_s9 = scalar_lea.vmem %s44_s14, 256  ;;  %p334_p6 = scmp.lt.s32.totalorder %s44_s14, %s44_s14 }
  0x2c   :  { %p330_p5 = scmp.ne.s32.totalorder %s44_s14, %s329_s9  ;;  %p335_p7 = scmp.lt.s32.totalorder %s329_s9, %s329_s9 }
  0x2e   :  { %p336_p8 = por %p335_p7, %p334_p6 }
  0x30   :  { %p337_p9 = pnand %p336_p8, %p330_p5 }
  0x32   :  { %340 = shalt.err (!%p337_p9)
}
  0x33   :  { %49 = dma.hbm_to_vmem [thread:$0]  %s511_s2, 256, %s44_s14, [#allocation6], %s394_s7, %s394_s7, %s395_s8  }
  0x34   :  { %385 = dma.done.wait [#allocation3], 64  }
  0x35   :  { %386 = vsyncadd [#allocation3], 4294967232 }
  0x36   :  { %387 = dma.done.wait [#allocation6], 512  }
  0x37   :  { %388 = vsyncadd [#allocation6], 4294966784  ;;  %v398_v0 = vmov 0.0   ;;  %vm399_vm0 = vmmov 0   ;;  %v269_v1 = vld [vmem:[#allocation7] sm:$0xff]   ;;  %v270_v2 = vld [vmem:[#allocation7 + $0x8] sm:$0xff]  }
  0x38   :  { %252 = vmatprep.subr.bf16.mxu1 %v398_v0  ;;  %256 = vmatprep.mubr.msk.bf16.mxu1 %vm399_vm0, %v398_v0  ;;  %v64_v3 = vld [vmem:[#allocation2] sm:$0xf]  ;;  %v271_v4 = vld [vmem:[#allocation5] sm:$0xff]   ;;  %v272_v6 = vld [vmem:[#allocation5 + $0x8] sm:$0xff]   ;;  %vm89_vm1 = vcmask 261120   ;;  %s400_s12 = smov [#allocation8]  }
  0x39   :  { %244 = vmatprep.subr.bf16.mxu0 %v398_v0  ;;  %248 = vmatprep.mubr.msk.bf16.mxu0 %vm399_vm0, %v398_v0  ;;  %v65_v5 = vpack.c.bf16 %v64_v3, %v64_v3  ;;  %v234_v7 = vld [vmem:[%s513_s4] ss:$0 sm:$0xff]  ;;  %s206_s13 = sshll.u32 %s400_s12, 4  ;;  %s207_s13 = int_to_ptr.vmem [resolvable:$true] %s206_s13 }
  0x3a   :  { %253 = vmatpush3.bf16.msra.mxu1 %v269_v1  ;;  %245 = vmatpush3.bf16.msra.mxu0 %v271_v4  ;;  %v230_v11 = vld [vmem:[%s512_s3] ss:$0 sm:$0xff]  ;;  %s341_s4 = scalar_lea.vmem %s207_s13, 64  ;;  %p346_p11 = scmp.lt.s32.totalorder %s207_s13, %s207_s13 }
  0x3b   :  { %254 = vmatprep.subr.bf16.mxu1 %v398_v0  ;;  %246 = vmatprep.subr.bf16.mxu0 %v398_v0  ;;  %p342_p10 = scmp.ne.s32.totalorder %s207_s13, %s341_s4  ;;  %p347_p12 = scmp.lt.s32.totalorder %s341_s4, %s341_s4 }
  0x3d   :  { %p348_p13 = por %p347_p12, %p346_p11 }
  0x3e   :  { %255 = vmatpush3.bf16.msra.mxu1 %v270_v2  ;;  %247 = vmatpush3.bf16.msra.mxu0 %v272_v6 }
  0x3f   :  { %p349_p0 = pnand %p348_p13, %p342_p10 }
  0x41   :  { %257 = vmatmul.mubr.msk.bf16.vlgmr.msra.gmra.mrb[0].mxu1 %vm89_vm1, %v65_v5  ;;  %249 = vmatmul.mubr.msk.bf16.vlgmr.msra.gmra.mrb[0].mxu0 %vm89_vm1, %v65_v5 }
 0x114   :  { %v191_v8 = vpop.f32.mrb[0].mxu1  ;;  %v127_v15 = vpop.f32.mrb[0].mxu0 }
 0x115   :  { %v192_v9 = vadd.f32 %v234_v7, %v191_v8  ;;  %v258_v10 = vpop.f32.mrb[1].mxu1  ;;  %v128_v16 = vadd.f32 %v230_v11, %v127_v15  ;;  %v250_v17 = vpop.f32.mrb[1].mxu0 }
 0x116   :  { %v194_v12 = vpop.f32.mrb[2].mxu1  ;;  %v130_v18 = vpop.f32.mrb[2].mxu0 }
 0x117   :  { %v197_v13 = vmul.f32 1.442695, %v192_v9  ;;  %v259_v14 = vpop.f32.mrb[3].mxu1  ;;  %133 = vst [vmem:[#allocation8] sm:$0xf] %v128_v16  ;;  %v251_v19 = vpop.f32.mrb[3].mxu0 }
 0x119   :  { %273 = vpow2.f32 %v197_v13 }
 0x11a   :  { %352 = shalt.err (!%p349_p0)
}
 0x11b   :  { %s353_s15 = scalar_lea.hbm %s514_s5, 64 }
 0x11c   :  { %p354_p1 = scmp.ne.s32.totalorder %s514_s5, %s353_s15  ;;  %p357_p2 = scmp.lt.u32.totalorder %s353_s15, %s514_s5 }
 0x11e   :  { %p359_p3 = pnand %p357_p2, %p354_p1 }
 0x120   :  { %362 = shalt.err (!%p359_p3)
}
 0x121   :  { %209 = dma.vmem_to_hbm [thread:$0]  %s207_s13, 64, %s514_s5, [#allocation4]  }
 0x122   :  { %s401_s1 = smov [#allocation9]  }
 0x123   :  { %s216_s22 = sshll.u32 %s401_s1, 4  ;;  %v274_v20 = vpop.eup %273  ;;  %s217_s22 = int_to_ptr.vmem [resolvable:$true] %s216_s22 }
 0x124   :  { %199 = vst [vmem:[#allocation9] sm:$0xf] %v274_v20  ;;  %s363_s23 = scalar_lea.vmem %s217_s22, 64  ;;  %p368_p5 = scmp.lt.s32.totalorder %s217_s22, %s217_s22 }
 0x125   :  { %p364_p4 = scmp.ne.s32.totalorder %s217_s22, %s363_s23  ;;  %p369_p6 = scmp.lt.s32.totalorder %s363_s23, %s363_s23 }
 0x127   :  { %p370_p7 = por %p369_p6, %p368_p5 }
 0x129   :  { %p371_p8 = pnand %p370_p7, %p364_p4 }
 0x12b   :  { %374 = shalt.err (!%p371_p8)
}
 0x12c   :  { %s375_s26 = scalar_lea.hbm %s515_s6, 64 }
 0x12d   :  { %p376_p9 = scmp.ne.s32.totalorder %s515_s6, %s375_s26  ;;  %p379_p10 = scmp.lt.u32.totalorder %s375_s26, %s515_s6 }
 0x12f   :  { %p381_p11 = pnand %p379_p10, %p376_p9 }
 0x131   :  { %384 = shalt.err (!%p381_p11)
}
 0x132   :  { %219 = dma.vmem_to_hbm [thread:$0]  %s217_s22, 64, %s515_s6, [#allocation10]  }
 0x133   :  { %389 = dma.done.wait [#allocation4], 64  }
 0x134   :  { %390 = vsyncadd [#allocation4], 4294967232 }
 0x135   :  { %391 = dma.done.wait [#allocation10], 64  }
 0x136   :  { %392 = vsyncadd [#allocation10], 4294967232 }
 0x137   :  { %226 = vsyncpa [#allocation3], 1 }
 0x138   :  { %227 = vsyncpa [#allocation6], 1 }
 0x139   :  { %228 = vsyncpa [#allocation4], 1 }
 0x13a   :  { %229 = vsyncpa [#allocation10], 1 }

</bundles_post_ra>
